<compile_context>
chip_gen: v7x
topology: tpu7x:2x2x1
jax: 0.10.0
libtpu: 0.0.40
codegen_flags: <defaults>
</compile_context>

<pallas_src>
import functools

import jax
import jax.numpy as jnp
from jax.experimental import pallas as pl
from jax.experimental.pallas import tpu as pltpu

LN_EPS = 1e-5  # PyTorch nn.LayerNorm default


def _round_up(x, m):
    return ((x + m - 1) // m) * m


def _layernorm(x, gamma, beta):
    mu = jnp.mean(x, axis=-1, keepdims=True)
    xc = x - mu
    var = jnp.mean(xc * xc, axis=-1, keepdims=True)
    return xc * jax.lax.rsqrt(var + LN_EPS) * gamma + beta


def critic_kernel(state_ref, action_ref, w1_ref, w2_ref, wa_ref,
                  vec1_ref, vec2_ref, out_ref):
    x = state_ref[...]                       # [TB, input_dims]
    a = action_ref[...]                      # [TB, n_agents * n_actions]

    vec1 = vec1_ref[...]                     # [3, fc1]: b1, g1, be1
    vec2 = vec2_ref[...]                     # [5, fc2]: b2, g2, be2+ba, wq, bq
    b1, g1, be1 = vec1[0:1, :], vec1[1:2, :], vec1[2:3, :]
    b2, g2, be2ba = vec2[0:1, :], vec2[1:2, :], vec2[2:3, :]
    wq_row, bq = vec2[3:4, :], vec2[4:5, 0:1]

    # fc1 -> LayerNorm(bn1) -> relu
    h1 = jnp.dot(x, w1_ref[...], preferred_element_type=jnp.float32) + b1
    h1 = jnp.maximum(_layernorm(h1, g1, be1), 0.0)

    # fc2 -> LayerNorm(bn2)   (action-value bias `ba` folded into beta)
    h2 = jnp.dot(h1, w2_ref[...], preferred_element_type=jnp.float32) + b2
    h2 = _layernorm(h2, g2, be2ba)

    # action branch (bias already folded above)
    av = jnp.dot(a, wa_ref[...], preferred_element_type=jnp.float32)

    # combine -> relu -> q head (VPU mul + XLU lane-reduction, no MXU)
    sav = jnp.maximum(h2 + av, 0.0)          # [TB, fc2]
    q = jnp.sum(sav * wq_row, axis=-1, keepdims=True) + bq
    out_ref[...] = q                         # [TB, 1]


@functools.partial(jax.jit, static_argnames=("block_b",))
def critic_forward(state, action, params, *, block_b=256):
    B, input_dims = state.shape
    na = action.shape[1]
    fc1 = params["w1"].shape[1]
    fc2 = params["w2"].shape[1]

    # Batch tiling: TB multiple of 8; pad B up so the grid divides evenly.
    TB = min(block_b, _round_up(B, 8))
    Bp = _round_up(B, TB)
    if Bp != B:
        state = jnp.pad(state, ((0, Bp - B), (0, 0)))
        action = jnp.pad(action, ((0, Bp - B), (0, 0)))

    # Pack small per-layer vectors into two operands (fewer DMAs).
    vec1 = jnp.concatenate([params["b1"], params["g1"], params["be1"]], axis=0)
    wq_row = params["wq"].T                                  # [1, fc2]
    bq_row = jnp.broadcast_to(params["bq"], (1, fc2))
    vec2 = jnp.concatenate(
        [params["b2"], params["g2"], params["be2"] + params["ba"],
         wq_row, bq_row], axis=0)

    grid = (Bp // TB,)
    out = pl.pallas_call(
        critic_kernel,
        grid=grid,
        in_specs=[
            pl.BlockSpec((TB, input_dims), lambda i: (i, 0)),   # state
            pl.BlockSpec((TB, na), lambda i: (i, 0)),           # action
            pl.BlockSpec((input_dims, fc1), lambda i: (0, 0)),  # w1
            pl.BlockSpec((fc1, fc2), lambda i: (0, 0)),         # w2
            pl.BlockSpec((na, fc2), lambda i: (0, 0)),          # wa
            pl.BlockSpec((3, fc1), lambda i: (0, 0)),           # vec1
            pl.BlockSpec((5, fc2), lambda i: (0, 0)),           # vec2
        ],
        out_specs=pl.BlockSpec((TB, 1), lambda i: (i, 0)),
        out_shape=jax.ShapeDtypeStruct((Bp, 1), jnp.float32),
        compiler_params=pltpu.CompilerParams(
            dimension_semantics=("parallel",)),
    )(state, action, params["w1"], params["w2"], params["wa"], vec1, vec2)
    return out[:B]


def init_params(key, input_dims, fc1_dims, fc2_dims, n_agents, n_actions):
    """Deterministic init mirroring the PyTorch __init__ uniform bounds.

    PyTorch code uses weight.size()[0] == out_features for the bound."""
    k = jax.random.split(key, 8)
    f1 = 1.0 / jnp.sqrt(fc1_dims)
    f2 = 1.0 / jnp.sqrt(fc2_dims)
    f3 = 0.003
    f4 = 1.0 / jnp.sqrt(fc2_dims)
    na = n_agents * n_actions

    def u(kk, shape, f):
        return jax.random.uniform(kk, shape, jnp.float32, -f, f)

    return {
        # weights stored [in, out] (transposed vs PyTorch [out, in])
        "w1": u(k[0], (input_dims, fc1_dims), f1),
        "b1": u(k[1], (1, fc1_dims), f1),
        "g1": jnp.ones((1, fc1_dims), jnp.float32),    # LayerNorm weight
        "be1": jnp.zeros((1, fc1_dims), jnp.float32),  # LayerNorm bias
        "w2": u(k[2], (fc1_dims, fc2_dims), f2),
        "b2": u(k[3], (1, fc2_dims), f2),
        "g2": jnp.ones((1, fc2_dims), jnp.float32),
        "be2": jnp.zeros((1, fc2_dims), jnp.float32),
        "wa": u(k[4], (na, fc2_dims), f4),
        "ba": u(k[5], (1, fc2_dims), f4),
        "wq": u(k[6], (fc2_dims, 1), f3),
        "bq": u(k[7], (1, 1), f3),
    }


def reference_forward(state, action, p):
    h1 = state @ p["w1"] + p["b1"]
    h1 = jnp.maximum(_layernorm(h1, p["g1"], p["be1"]), 0.0)
    h2 = h1 @ p["w2"] + p["b2"]
    h2 = _layernorm(h2, p["g2"], p["be2"])
    av = action @ p["wa"] + p["ba"]
    sav = jnp.maximum(h2 + av, 0.0)
    return sav @ p["wq"] + p["bq"]


if __name__ == "__main__":
    # Small shapes consistent with the module's forward.
    B = 8
    input_dims, fc1_dims, fc2_dims = 32, 64, 64
    n_agents, n_actions = 2, 4

    key = jax.random.PRNGKey(0)
    k_state, k_action, k_params = jax.random.split(key, 3)

    state = jax.random.normal(k_state, (B, input_dims), jnp.float32)
    action = jax.random.normal(k_action, (B, n_agents * n_actions), jnp.float32)
    params = init_params(k_params, input_dims, fc1_dims, fc2_dims,
                         n_agents, n_actions)

    out = critic_forward(state, action, params)
    jax.block_until_ready(out)

    ref = reference_forward(state, action, params)
    assert out.shape == (B, 1)
    assert jnp.allclose(out, ref, atol=1e-4, rtol=1e-4)

    print("KERNEL_OK")
</pallas_src>

<mosaic_0001>
module attributes {stable_mosaic.version = 11 : i64} {
  func.func @critic_kernel(%arg0: i32, %arg1: memref<8x32xf32, #tpu.memory_space<vmem>>, %arg2: memref<8x8xf32, #tpu.memory_space<vmem>>, %arg3: memref<32x64xf32, #tpu.memory_space<vmem>>, %arg4: memref<64x64xf32, #tpu.memory_space<vmem>>, %arg5: memref<8x64xf32, #tpu.memory_space<vmem>>, %arg6: memref<3x64xf32, #tpu.memory_space<vmem>>, %arg7: memref<5x64xf32, #tpu.memory_space<vmem>>, %arg8: memref<8x1xf32, #tpu.memory_space<vmem>>) attributes {dimension_semantics = [#tpu.dimension_semantics<parallel>], iteration_bounds = array<i64: 1>, scalar_prefetch = 0 : i64, scratch_operands = 0 : i64, tpu.core_type = #tpu.core_type<tc>, window_params = [{transform_indices = @transform_0, window_bounds = array<i64: 8, 32>}, {transform_indices = @transform_1, window_bounds = array<i64: 8, 8>}, {pipeline_mode = #tpu.pipeline_mode<synchronous>, transform_indices = @transform_2, window_bounds = array<i64: 32, 64>}, {pipeline_mode = #tpu.pipeline_mode<synchronous>, transform_indices = @transform_3, window_bounds = array<i64: 64, 64>}, {pipeline_mode = #tpu.pipeline_mode<synchronous>, transform_indices = @transform_4, window_bounds = array<i64: 8, 64>}, {pipeline_mode = #tpu.pipeline_mode<synchronous>, transform_indices = @transform_5, window_bounds = array<i64: 3, 64>}, {pipeline_mode = #tpu.pipeline_mode<synchronous>, transform_indices = @transform_6, window_bounds = array<i64: 5, 64>}, {transform_indices = @transform_7, window_bounds = array<i64: 8, 1>}]} {
    %c0 = arith.constant 0 : index
    %c0_0 = arith.constant 0 : index
    %0 = vector.load %arg1[%c0, %c0_0] : memref<8x32xf32, #tpu.memory_space<vmem>>, vector<8x32xf32>
    %c0_1 = arith.constant 0 : index
    %c0_2 = arith.constant 0 : index
    %1 = vector.load %arg2[%c0_1, %c0_2] : memref<8x8xf32, #tpu.memory_space<vmem>>, vector<8x8xf32>
    %c0_3 = arith.constant 0 : index
    %c0_4 = arith.constant 0 : index
    %2 = vector.load %arg6[%c0_3, %c0_4] : memref<3x64xf32, #tpu.memory_space<vmem>>, vector<3x64xf32>
    %c0_5 = arith.constant 0 : index
    %c0_6 = arith.constant 0 : index
    %3 = vector.load %arg7[%c0_5, %c0_6] : memref<5x64xf32, #tpu.memory_space<vmem>>, vector<5x64xf32>
    %4 = vector.extract_strided_slice %2 {offsets = [0, 0], sizes = [1, 64], strides = [1, 1]} : vector<3x64xf32> to vector<1x64xf32>
    %5 = vector.extract_strided_slice %2 {offsets = [1, 0], sizes = [1, 64], strides = [1, 1]} : vector<3x64xf32> to vector<1x64xf32>
    %6 = vector.extract_strided_slice %2 {offsets = [2, 0], sizes = [1, 64], strides = [1, 1]} : vector<3x64xf32> to vector<1x64xf32>
    %7 = vector.extract_strided_slice %3 {offsets = [0, 0], sizes = [1, 64], strides = [1, 1]} : vector<5x64xf32> to vector<1x64xf32>
    %8 = vector.extract_strided_slice %3 {offsets = [1, 0], sizes = [1, 64], strides = [1, 1]} : vector<5x64xf32> to vector<1x64xf32>
    %9 = vector.extract_strided_slice %3 {offsets = [2, 0], sizes = [1, 64], strides = [1, 1]} : vector<5x64xf32> to vector<1x64xf32>
    %10 = vector.extract_strided_slice %3 {offsets = [3, 0], sizes = [1, 64], strides = [1, 1]} : vector<5x64xf32> to vector<1x64xf32>
    %11 = vector.extract_strided_slice %3 {offsets = [4, 0], sizes = [1, 1], strides = [1, 1]} : vector<5x64xf32> to vector<1x1xf32>
    %c0_7 = arith.constant 0 : index
    %c0_8 = arith.constant 0 : index
    %12 = vector.load %arg3[%c0_7, %c0_8] : memref<32x64xf32, #tpu.memory_space<vmem>>, vector<32x64xf32>
    %cst = arith.constant dense<0.000000e+00> : vector<8x64xf32>
    %13 = tpu.matmul %0, %12, %cst {dimension_numbers = #tpu.dot_dimension_numbers<[1], [0], [0], [1], [0, 0, 1, 1], [], []>} : vector<8x32xf32>, vector<32x64xf32>, vector<8x64xf32> -> vector<8x64xf32>
    %14 = vector.broadcast %4 : vector<1x64xf32> to vector<8x64xf32>
    %15 = arith.addf %13, %14 : vector<8x64xf32>
    %cst_9 = arith.constant dense<0.000000e+00> : vector<8xf32>
    %16 = vector.multi_reduction <add>, %15, %cst_9 [1] : vector<8x64xf32> to vector<8xf32>
    %17 = vector.shape_cast %16 : vector<8xf32> to vector<8x1xf32>
    %cst_10 = arith.constant 6.400000e+01 : f32
    %18 = vector.broadcast %cst_10 : f32 to vector<8x1xf32>
    %19 = arith.divf %17, %18 : vector<8x1xf32>
    %20 = vector.broadcast %19 : vector<8x1xf32> to vector<8x64xf32>
    %21 = arith.subf %15, %20 : vector<8x64xf32>
    %22 = arith.mulf %21, %21 : vector<8x64xf32>
    %cst_11 = arith.constant dense<0.000000e+00> : vector<8xf32>
    %23 = vector.multi_reduction <add>, %22, %cst_11 [1] : vector<8x64xf32> to vector<8xf32>
    %24 = vector.shape_cast %23 : vector<8xf32> to vector<8x1xf32>
    %cst_12 = arith.constant 6.400000e+01 : f32
    %25 = vector.broadcast %cst_12 : f32 to vector<8x1xf32>
    %26 = arith.divf %24, %25 : vector<8x1xf32>
    %cst_13 = arith.constant 9.99999974E-6 : f32
    %27 = vector.broadcast %cst_13 : f32 to vector<8x1xf32>
    %28 = arith.addf %26, %27 : vector<8x1xf32>
    %29 = math.rsqrt %28 : vector<8x1xf32>
    %30 = vector.broadcast %29 : vector<8x1xf32> to vector<8x64xf32>
    %31 = arith.mulf %21, %30 : vector<8x64xf32>
    %32 = vector.broadcast %5 : vector<1x64xf32> to vector<8x64xf32>
    %33 = arith.mulf %31, %32 : vector<8x64xf32>
    %34 = vector.broadcast %6 : vector<1x64xf32> to vector<8x64xf32>
    %35 = arith.addf %33, %34 : vector<8x64xf32>
    %cst_14 = arith.constant 0.000000e+00 : f32
    %36 = vector.broadcast %cst_14 : f32 to vector<8x64xf32>
    %37 = arith.maximumf %35, %36 : vector<8x64xf32>
    %c0_15 = arith.constant 0 : index
    %c0_16 = arith.constant 0 : index
    %38 = vector.load %arg4[%c0_15, %c0_16] : memref<64x64xf32, #tpu.memory_space<vmem>>, vector<64x64xf32>
    %cst_17 = arith.constant dense<0.000000e+00> : vector<8x64xf32>
    %39 = tpu.matmul %37, %38, %cst_17 {dimension_numbers = #tpu.dot_dimension_numbers<[1], [0], [0], [1], [0, 0, 1, 1], [], []>} : vector<8x64xf32>, vector<64x64xf32>, vector<8x64xf32> -> vector<8x64xf32>
    %40 = vector.broadcast %7 : vector<1x64xf32> to vector<8x64xf32>
    %41 = arith.addf %39, %40 : vector<8x64xf32>
    %cst_18 = arith.constant dense<0.000000e+00> : vector<8xf32>
    %42 = vector.multi_reduction <add>, %41, %cst_18 [1] : vector<8x64xf32> to vector<8xf32>
    %43 = vector.shape_cast %42 : vector<8xf32> to vector<8x1xf32>
    %cst_19 = arith.constant 6.400000e+01 : f32
    %44 = vector.broadcast %cst_19 : f32 to vector<8x1xf32>
    %45 = arith.divf %43, %44 : vector<8x1xf32>
    %46 = vector.broadcast %45 : vector<8x1xf32> to vector<8x64xf32>
    %47 = arith.subf %41, %46 : vector<8x64xf32>
    %48 = arith.mulf %47, %47 : vector<8x64xf32>
    %cst_20 = arith.constant dense<0.000000e+00> : vector<8xf32>
    %49 = vector.multi_reduction <add>, %48, %cst_20 [1] : vector<8x64xf32> to vector<8xf32>
    %50 = vector.shape_cast %49 : vector<8xf32> to vector<8x1xf32>
    %cst_21 = arith.constant 6.400000e+01 : f32
    %51 = vector.broadcast %cst_21 : f32 to vector<8x1xf32>
    %52 = arith.divf %50, %51 : vector<8x1xf32>
    %cst_22 = arith.constant 9.99999974E-6 : f32
    %53 = vector.broadcast %cst_22 : f32 to vector<8x1xf32>
    %54 = arith.addf %52, %53 : vector<8x1xf32>
    %55 = math.rsqrt %54 : vector<8x1xf32>
    %56 = vector.broadcast %55 : vector<8x1xf32> to vector<8x64xf32>
    %57 = arith.mulf %47, %56 : vector<8x64xf32>
    %58 = vector.broadcast %8 : vector<1x64xf32> to vector<8x64xf32>
    %59 = arith.mulf %57, %58 : vector<8x64xf32>
    %60 = vector.broadcast %9 : vector<1x64xf32> to vector<8x64xf32>
    %61 = arith.addf %59, %60 : vector<8x64xf32>
    %c0_23 = arith.constant 0 : index
    %c0_24 = arith.constant 0 : index
    %62 = vector.load %arg5[%c0_23, %c0_24] : memref<8x64xf32, #tpu.memory_space<vmem>>, vector<8x64xf32>
    %cst_25 = arith.constant dense<0.000000e+00> : vector<8x64xf32>
    %63 = tpu.matmul %1, %62, %cst_25 {dimension_numbers = #tpu.dot_dimension_numbers<[1], [0], [0], [1], [0, 0, 1, 1], [], []>} : vector<8x8xf32>, vector<8x64xf32>, vector<8x64xf32> -> vector<8x64xf32>
    %64 = arith.addf %61, %63 : vector<8x64xf32>
    %cst_26 = arith.constant 0.000000e+00 : f32
    %65 = vector.broadcast %cst_26 : f32 to vector<8x64xf32>
    %66 = arith.maximumf %64, %65 : vector<8x64xf32>
    %67 = vector.broadcast %10 : vector<1x64xf32> to vector<8x64xf32>
    %68 = arith.mulf %66, %67 : vector<8x64xf32>
    %cst_27 = arith.constant dense<0.000000e+00> : vector<8xf32>
    %69 = vector.multi_reduction <add>, %68, %cst_27 [1] : vector<8x64xf32> to vector<8xf32>
    %70 = vector.shape_cast %69 : vector<8xf32> to vector<8x1xf32>
    %71 = vector.broadcast %11 : vector<1x1xf32> to vector<8x1xf32>
    %72 = arith.addf %70, %71 : vector<8x1xf32>
    %c0_28 = arith.constant 0 : index
    %c0_29 = arith.constant 0 : index
    %73 = vector.load %arg8[%c0_28, %c0_29] : memref<8x1xf32, #tpu.memory_space<vmem>>, vector<8x1xf32>
    tpu.vector_store %arg8[%c0_28, %c0_29], %72 {strides = array<i32>} : memref<8x1xf32, #tpu.memory_space<vmem>>, vector<8x1xf32>,
    return
  }
  func.func @transform_0(%arg0: i32) -> (i32, i32) {
    %c0_i32 = arith.constant 0 : i32
    %c0_i32_0 = arith.constant 0 : i32
    return %arg0, %c0_i32 : i32, i32
  }
  func.func @transform_1(%arg0: i32) -> (i32, i32) {
    %c0_i32 = arith.constant 0 : i32
    %c0_i32_0 = arith.constant 0 : i32
    return %arg0, %c0_i32 : i32, i32
  }
  func.func @transform_2(%arg0: i32) -> (i32, i32) {
    %c0_i32 = arith.constant 0 : i32
    %c0_i32_0 = arith.constant 0 : i32
    %c0_i32_1 = arith.constant 0 : i32
    return %c0_i32, %c0_i32_0 : i32, i32
  }
  func.func @transform_3(%arg0: i32) -> (i32, i32) {
    %c0_i32 = arith.constant 0 : i32
    %c0_i32_0 = arith.constant 0 : i32
    %c0_i32_1 = arith.constant 0 : i32
    return %c0_i32, %c0_i32_0 : i32, i32
  }
  func.func @transform_4(%arg0: i32) -> (i32, i32) {
    %c0_i32 = arith.constant 0 : i32
    %c0_i32_0 = arith.constant 0 : i32
    %c0_i32_1 = arith.constant 0 : i32
    return %c0_i32, %c0_i32_0 : i32, i32
  }
  func.func @transform_5(%arg0: i32) -> (i32, i32) {
    %c0_i32 = arith.constant 0 : i32
    %c0_i32_0 = arith.constant 0 : i32
    %c0_i32_1 = arith.constant 0 : i32
    return %c0_i32, %c0_i32_0 : i32, i32
  }
  func.func @transform_6(%arg0: i32) -> (i32, i32) {
    %c0_i32 = arith.constant 0 : i32
    %c0_i32_0 = arith.constant 0 : i32
    %c0_i32_1 = arith.constant 0 : i32
    return %c0_i32, %c0_i32_0 : i32, i32
  }
  func.func @transform_7(%arg0: i32) -> (i32, i32) {
    %c0_i32 = arith.constant 0 : i32
    %c0_i32_0 = arith.constant 0 : i32
    return %arg0, %c0_i32 : i32, i32
  }
}

</mosaic_0001>

<bundles_post_ra>
// kernel: critic_forward.1
= control target key start
LH: loop header
LB: loop body
LE: loop exit
PB: predicated region body
PF: predicated region fallthrough
CT: control target
= control target key end

     0   :  { %12 = vsyncpa [#allocation3], 0  ;;  %s634_s0 = inlined_call_operand.vmem [shape: f32[8,32], index: 0, kind: input, shape index: {}]   ;;  %s635_s1 = inlined_call_operand.hbm [shape: f32[8,8], index: 1, kind: input, shape index: {}]   ;;  %s636_s2 = inlined_call_operand.hbm [shape: f32[32,64], index: 2, kind: input, shape index: {}]   ;;  %s637_s3 = inlined_call_operand.vmem [shape: f32[64,64], index: 3, kind: input, shape index: {}]   ;;  %s638_s4 = inlined_call_operand.vmem [shape: f32[8,64], index: 4, kind: input, shape index: {}]   ;;  %s639_s5 = inlined_call_operand.vmem [shape: f32[3,64], index: 5, kind: input, shape index: {}]   ;;  %s640_s6 = inlined_call_operand.vmem [shape: f32[5,64], index: 6, kind: input, shape index: {}]   ;;  %s641_s7 = inlined_call_operand.vmem [shape: f32[8,1], index: 7, kind: output, shape index: {}]  }
   0x1   :  { %13 = vsyncpa [#allocation5], 0  ;;  %s501_s24 = smov [#allocation2]   ;;  %s502_s26 = smov [#allocation4]  }
   0x2   :  { %s22_s25 = sshll.u32 %s501_s24, 4  ;;  %s31_s27 = sshll.u32 %s502_s26, 4  ;;  %s23_s25 = int_to_ptr.vmem [resolvable:$true] %s22_s25  ;;  %s548_s27 = int_to_ptr.vmem [resolvable:$true] %s31_s27 }
   0x3   :  { %s453_s30 = scalar_lea.hbm %s635_s1, 128 }
   0x4   :  { %p454_p0 = scmp.ne.s32.totalorder %s635_s1, %s453_s30  ;;  %p457_p1 = scmp.lt.u32.totalorder %s453_s30, %s635_s1 }
   0x6   :  { %p459_p2 = pnand %p457_p1, %p454_p0 }
   0x8   :  { %462 = shalt.err (!%p459_p2)
}
   0x9   :  { %s463_s12 = scalar_lea.vmem %s23_s25, 128  ;;  %p468_p4 = scmp.lt.s32.totalorder %s23_s25, %s23_s25 }
   0xa   :  { %p464_p3 = scmp.ne.s32.totalorder %s23_s25, %s463_s12  ;;  %p469_p5 = scmp.lt.s32.totalorder %s463_s12, %s463_s12 }
   0xc   :  { %p470_p6 = por %p469_p5, %p468_p4 }
   0xe   :  { %p471_p7 = pnand %p470_p6, %p464_p3 }
  0x10   :  { %474 = shalt.err (!%p471_p7)
}
  0x11   :  { %25 = dma.hbm_to_vmem [thread:$0]  %s635_s1, 128, %s23_s25, [#allocation3]  }
  0x12   :  { %s475_s17 = scalar_lea.hbm %s636_s2, 512 }
  0x13   :  { %p476_p8 = scmp.ne.s32.totalorder %s636_s2, %s475_s17  ;;  %p479_p9 = scmp.lt.u32.totalorder %s475_s17, %s636_s2 }
  0x15   :  { %p481_p10 = pnand %p479_p9, %p476_p8 }
  0x17   :  { %484 = shalt.err (!%p481_p10)
}
  0x18   :  { %s485_s22 = scalar_lea.vmem %s548_s27, 512  ;;  %p490_p12 = scmp.lt.s32.totalorder %s548_s27, %s548_s27 }
  0x19   :  { %p486_p11 = scmp.ne.s32.totalorder %s548_s27, %s485_s22  ;;  %p491_p13 = scmp.lt.s32.totalorder %s485_s22, %s485_s22 }
  0x1b   :  { %p492_p0 = por %p491_p13, %p490_p12 }
  0x1d   :  { %p493_p1 = pnand %p492_p0, %p486_p11 }
  0x1f   :  { %496 = shalt.err (!%p493_p1)
}
  0x20   :  { %s503_s1 = smov 128   ;;  %s504_s23 = smov 8  }
  0x21   :  { %37 = dma.hbm_to_vmem [thread:$0]  %s636_s2, 512, %s548_s27, [#allocation5], %s503_s1, %s503_s1, %s504_s23  }
  0x22   :  { %497 = dma.done.wait [#allocation3], 128  }
  0x23   :  { %498 = vsyncadd [#allocation3], 4294967168 }
  0x24   :  { %499 = dma.done.wait [#allocation5], 512  }
  0x25   :  { %500 = vsyncadd [#allocation5], 4294966784  ;;  %v505_v0 = vmov 0.0|0.0   ;;  %vm506_vm0 = vmmov 0   ;;  %v507_v1 = vmov 0.0   ;;  %v56_v2 = vld [vmem:[#allocation4] sm:$0xff]  ;;  %v60_v9 = vlaneseq }
  0x26   :  { %424 = vmatprep.subr.bf16.mxu0 %v505_v0  ;;  %397 = vmatprep.mubr.msk.f32.mxu0 %vm506_vm0, %v507_v1  ;;  %v57_v3 = vld [vmem:[#allocation4 + $0x8] sm:$0xff]  ;;  %v58_v4 = vld [vmem:[#allocation4 + $0x10] sm:$0xff]  ;;  %v59_v6 = vld [vmem:[#allocation4 + $0x18] sm:$0xff]  ;;  %vm64_vm1 = vcmask 261120   ;;  %vm138_vm2 = vcmask 523264   ;;  %vm273_vm3 = vcmask 64512  }
  0x27   :  { %430 = vmatprep.subr.bf16.mxu1 %v505_v0  ;;  %416 = vmatprep.mubr.msk.f32.mxu1 %vm506_vm0, %v507_v1  ;;  %v425_v5 = vpack.c.bf16 %v57_v3, %v56_v2  ;;  %v428_v7 = vpack.c.bf16 %v59_v6, %v58_v4  ;;  %v52_v8 = vld [vmem:[%s634_s0] sm:$0xff]  ;;  %v585_v10 = vshrl.u32 %v60_v9, 7  ;;  %v165_v24 = vld [vmem:[%s637_s3 + $0x8] sm:$0xff]  ;;  %v166_v25 = vld [vmem:[%s637_s3 + $0x10] sm:$0xff]  ;;  %vm362_vm4 = vcmask 7168  }
  0x28   :  { %v54_v12 = vld [vmem:[%s639_s5] sm:$0x7]  ;;  %v167_v27 = vld [vmem:[%s637_s3 + $0x18] sm:$0xff]  ;;  %v169_v30 = vld [vmem:[%s637_s3 + $0x28] sm:$0xff] }
  0x29   :  { %426 = vmatpush3.bf16.msra.mxu0 %v425_v5  ;;  %v62_v11 = vsub.s32 0, %v585_v10  ;;  %v164_v23 = vld [vmem:[%s637_s3] sm:$0xff]  ;;  %v434_v28 = vpack.c.bf16 %v167_v27, %v166_v25  ;;  %v170_v32 = vld [vmem:[%s637_s3 + $0x30] sm:$0xff]  ;;  %v171_v33 = vld [vmem:[%s637_s3 + $0x38] sm:$0xff]  ;;  %v155_v38 = vsub.s32 1, %v585_v10  ;;  %v160_v39 = vsub.s32 2, %v585_v10 }
  0x2a   :  { %427 = vmatprep.subr.bf16.mxu0 %v505_v0  ;;  %v431_v26 = vpack.c.bf16 %v165_v24, %v164_v23  ;;  %v168_v29 = vld [vmem:[%s637_s3 + $0x20] sm:$0xff]  ;;  %v440_v34 = vpack.c.bf16 %v171_v33, %v170_v32  ;;  %v351_v6 = vsub.s32 3, %v585_v10 }
  0x2b   :  { %v63_v13 = vrot.slane %v54_v12, %v62_v11  ;;  %v437_v31 = vpack.c.bf16 %v169_v30, %v168_v29  ;;  %v156_v40 = vrot.slane %v54_v12, %v155_v38  ;;  %v161_v42 = vrot.slane %v54_v12, %v160_v39  ;;  %v272_v47 = vld [vmem:[%s638_s4] sm:$0xff] }
  0x2c   :  { %432 = vmatpush3.bf16.msra.mxu1 %v431_v26  ;;  %v53_v48 = vld [vmem:[#allocation2] sm:$0xff] }
  0x2d   :  { %429 = vmatpush3.bf16.msra.mxu0 %v428_v7  ;;  %433 = vmatprep.subr.bf16.mxu1 %v505_v0  ;;  %v55_v49 = vld [vmem:[%s640_s6] sm:$0x1f] }
  0x2e   :  { %419 = vmatprep.subr.mxu0 %v507_v1  ;;  %v175_v50 = vrot.slane %v55_v49, %v62_v11  ;;  %v270_v4 = vrot.slane %v55_v49, %v160_v39  ;;  %v352_v9 = vrot.slane %v55_v49, %v351_v6 }
  0x30   :  { %398 = vmatmul.mubr.msk.f32.vlgmr.msra.gmra.mrb[0].mxu0 %vm64_vm1, %v52_v8  ;;  %435 = vmatpush3.bf16.msra.mxu1 %v434_v28 }
  0x31   :  { %421 = vmatprep.mubr.msk.f32.mxu0 %vm506_vm0, %v507_v1  ;;  %436 = vmatprep.subr.bf16.mxu1 %v505_v0  ;;  %v265_v1 = vrot.slane %v55_v49, %v155_v38 }
  0x32   :  { %420 = vmatpush3.msra.mxu0 %v272_v47 }
  0x34   :  { %438 = vmatpush3.bf16.msra.mxu1 %v437_v31  ;;  %422 = vmatmul.mubr.msk.f32.vlgmr.msra.gmra.mrb[2].mxu0 %vm273_vm3, %v53_v48 }
  0x35   :  { %439 = vmatprep.subr.bf16.mxu1 %v505_v0 }
  0x38   :  { %441 = vmatpush3.bf16.msra.mxu1 %v440_v34 }
 0x103   :  { %v134_v14 = vpop.f32.mrb[0].mxu0 }
 0x104   :  { %v135_v15 = vadd.f32 %v134_v14, %v63_v13  ;;  %v399_v16 = vpop.f32.mrb[1].mxu0  ;;  %v359_v14 = vsub.s32 4, %v585_v10 }
 0x106   :  { %v139_v17 = vsel %vm138_vm2, %v135_v15, 0.0 }
 0x107   :  { %140 = vadd.xlane.f32.xlu0 %v139_v17  ;;  %v343_v60 = vpop.f32.mrb[2].mxu0 }
 0x108   :  { %v423_v61 = vpop.f32.mrb[3].mxu0 }
 0x194   :  { %v141_v18 = vpop.xlane.xlu0 %140 }
 0x195   :  { %v143_v19 = vmul.f32 0.015625, %v141_v18 }
 0x197   :  { %v144_v20 = vsub.f32 %v135_v15, %v143_v19  ;;  %v360_v15 = vrot.slane %v55_v49, %v359_v14 }
 0x199   :  { %v145_v21 = vmul.f32 %v144_v20, %v144_v20 }
 0x19b   :  { %v146_v22 = vsel %vm138_vm2, %v145_v21, 0.0 }
 0x19c   :  { %147 = vadd.xlane.f32.xlu0 %v146_v22 }
 0x229   :  { %v148_v35 = vpop.xlane.xlu0 %147 }
 0x22a   :  { %v149_v36 = vmul.f32 0.015625, %v148_v35 }
 0x22c   :  { %v150_v37 = vadd.f32 1e-05, %v149_v36 }
 0x22e   :  { %449 = vrsqrt.f32 %v150_v37 }
 0x238   :  { %v450_v41 = vpop.eup %449 }
 0x239   :  { %v152_v43 = vmul.f32 %v450_v41, %v144_v20 }
 0x23b   :  { %v157_v44 = vmul.f32 %v156_v40, %v152_v43 }
 0x23d   :  { %v162_v45 = vadd.f32 %v161_v42, %v157_v44 }
 0x23f   :  { %v163_v46 = vmax.f32 %v162_v45, 0.0 }
 0x241   :  { %417 = vmatmul.mubr.msk.f32.vlgmr.msra.gmra.mrb[0].mxu1 %vm138_vm2, %v163_v46 }
 0x314   :  { %v245_v51 = vpop.f32.mrb[0].mxu1 }
 0x315   :  { %v246_v52 = vadd.f32 %v245_v51, %v175_v50  ;;  %v418_v53 = vpop.f32.mrb[1].mxu1 }
 0x317   :  { %v249_v54 = vsel %vm138_vm2, %v246_v52, 0.0 }
 0x318   :  { %250 = vadd.xlane.f32.xlu1 %v249_v54 }
 0x3a5   :  { %v251_v55 = vpop.xlane.xlu1 %250 }
 0x3a6   :  { %v252_v56 = vmul.f32 0.015625, %v251_v55 }
 0x3a8   :  { %v253_v57 = vsub.f32 %v246_v52, %v252_v56 }
 0x3aa   :  { %v254_v58 = vmul.f32 %v253_v57, %v253_v57 }
 0x3ac   :  { %v255_v59 = vsel %vm138_vm2, %v254_v58, 0.0 }
 0x3ad   :  { %256 = vadd.xlane.f32.xlu1 %v255_v59 }
 0x43a   :  { %v257_v62 = vpop.xlane.xlu1 %256 }
 0x43b   :  { %v258_v63 = vmul.f32 0.015625, %v257_v62 }
 0x43d   :  { %v259_v0 = vadd.f32 1e-05, %v258_v63 }
 0x43f   :  { %451 = vrsqrt.f32 %v259_v0 }
 0x449   :  { %v452_v2 = vpop.eup %451 }
 0x44a   :  { %v261_v3 = vmul.f32 %v452_v2, %v253_v57 }
 0x44c   :  { %v266_v5 = vmul.f32 %v265_v1, %v261_v3 }
 0x44e   :  { %v271_v7 = vadd.f32 %v270_v4, %v266_v5 }
 0x450   :  { %v347_v8 = vadd.f32 %v343_v60, %v271_v7 }
 0x452   :  { %v348_v11 = vmax.f32 %v347_v8, 0.0 }
 0x454   :  { %v353_v12 = vmul.f32 %v352_v9, %v348_v11 }
 0x456   :  { %v354_v13 = vsel %vm138_vm2, %v353_v12, 0.0 }
 0x457   :  { %355 = vadd.xlane.f32.xlu0 %v354_v13 }
 0x4e4   :  { %v356_v16 = vpop.xlane.xlu0 %355 }
 0x4e5   :  { %v361_v17 = vadd.f32 %v360_v15, %v356_v16 }
 0x4e7   :  { %363 = vst.msk [vmem:[%s641_s7] sm:$0xff] %vm362_vm4, %v361_v17 }
 0x4e8   :  { %368 = vsyncpa [#allocation3], 1 }
 0x4e9   :  { %369 = vsyncpa [#allocation5], 1 }

</bundles_post_ra>
